<compile_context>
chip_gen: v7x
topology: tpu7x:2x2x1
jax: 0.10.0
libtpu: 0.0.40
codegen_flags: <defaults>
</compile_context>

<pallas_src>
import functools

import jax
import jax.numpy as jnp
from jax import lax
from jax.experimental import pallas as pl
from jax.experimental.pallas import tpu as pltpu

K = 11  # MaxPool2d(kernel_size=11, stride=0) -> stride == kernel_size


def _tree_max(vals):
    """Pairwise-tree max of a list of equal-shaped arrays (short dep chain)."""
    vals = list(vals)
    while len(vals) > 1:
        nxt = [jnp.maximum(vals[i], vals[i + 1])
               for i in range(0, len(vals) - 1, 2)]
        if len(vals) % 2:
            nxt.append(vals[-1])
        vals = nxt
    return vals[0]


def _mil_maxpool_kernel(x_ref, o_ref, *, k, oh, ow):
    # x_ref: (cb, h, w) natural-layout block; o_ref: (cb, oh, ow).
    cb = x_ref.shape[0]
    col_ids = lax.broadcasted_iota(jnp.int32, (1, ow), 1)   # hoisted once
    for r in range(oh):
        # --- H fold: 11 statically indexed rows, lane-parallel VPU maxes ---
        hrow = _tree_max([x_ref[:, r * k + t, :] for t in range(k)])  # (cb, w)
        # --- W fold: per output column, max over 11 consecutive lanes ---
        row = jnp.zeros((cb, ow), dtype=hrow.dtype)
        for c in range(ow):
            col_max = jnp.max(hrow[:, c * k:(c + 1) * k],
                              axis=-1, keepdims=True)                 # (cb, 1)
            row = jnp.where(col_ids == c, col_max, row)               # (cb, ow)
        o_ref[:, r, :] = row


def _pick_channel_block(nc, h, w, itemsize, budget_bytes=6 << 20):
    """Channels per grid step: biggest block under ~6 MiB per buffer (safe with
    double-buffering inside a 32 MiB vmem limit on every TPU generation), but
    at least 4 grid steps when nc allows so both v7x TensorCores get >= 2
    steps each and DMA/compute overlap."""
    h_pad = -(-h // 8) * 8            # sublane padding of the VMEM tile
    w_pad = -(-w // 128) * 128        # lane padding
    per_chan = h_pad * w_pad * itemsize
    # NOTE: for extremely large spatial extents (h*w*4 > budget) a single
    # channel may exceed the budget; MIL feature maps are small so we accept
    # that instead of adding a second (row-tiled) grid axis.
    cb = max(1, int(budget_bytes // per_chan))
    cb = min(cb, nc)
    if nc >= 4:
        cb = min(cb, -(-nc // 4))     # >= 4 grid steps (2 per v7x TC)
    return cb


def mil_precision_score_mapping(x, score=None, precision=None, mil_prob=None,
                                *, kernel_size=K):
    """out = MaxPool2d(kernel_size=11, stride=kernel_size)(x); extra args ignored."""
    n, c, h, w = x.shape
    k = kernel_size
    oh, ow = h // k, w // k                      # floor mode, no padding
    if oh == 0 or ow == 0:
        raise ValueError(
            f"MIL_Precision_Score_Mapping: spatial dims ({h}, {w}) are smaller "
            f"than the {k}x{k} pooling window.")
    nc = n * c

    # Free reshape only — no transpose, no crop copy (the crop is implicit:
    # the kernel never reads the trailing h % k rows / w % k columns).
    x3 = x.reshape(nc, h, w)

    cb = _pick_channel_block(nc, h, w, x3.dtype.itemsize)
    grid = (pl.cdiv(nc, cb),)                    # ragged last block is fine

    itemsize = x3.dtype.itemsize
    cost = pl.CostEstimate(
        flops=int(nc) * oh * ow * (k * k - 1),   # comparisons
        transcendentals=0,
        bytes_accessed=int(nc) * h * w * itemsize + int(nc) * oh * ow * itemsize,
    )

    out = pl.pallas_call(
        functools.partial(_mil_maxpool_kernel, k=k, oh=oh, ow=ow),
        out_shape=jax.ShapeDtypeStruct((nc, oh, ow), x.dtype),
        grid=grid,
        # Last two block dims equal the full array dims, so the (8, 128)
        # divisibility rule holds for arbitrary H/W, and each block is one
        # contiguous HBM run of cb*h*w elements (dense DMA bursts).
        in_specs=[pl.BlockSpec((cb, h, w), lambda i: (i, 0, 0))],
        out_specs=pl.BlockSpec((cb, oh, ow), lambda i: (i, 0, 0)),
        compiler_params=pltpu.CompilerParams(
            dimension_semantics=("parallel",),
            vmem_limit_bytes=32 * 1024 * 1024,
        ),
        cost_estimate=cost,
    )(x3)

    # (n*c, oh, ow) -> (n, c, oh, ow): pure reshape, free.
    return out.reshape(n, c, oh, ow)


if __name__ == "__main__":
    key = jax.random.PRNGKey(0)
    kx, ks, kp, km, k2 = jax.random.split(key, 5)

    # small shapes consistent with an 11x11 pooling window: 22x22 -> 2x2
    n, c, h, w = 2, 4, 22, 22
    x = jax.random.normal(kx, (n, c, h, w), dtype=jnp.float32)
    score = jax.random.normal(ks, (n, c), dtype=jnp.float32)       # unused
    precision = jax.random.normal(kp, (n, c), dtype=jnp.float32)   # unused
    mil_prob = jax.random.normal(km, (n, c), dtype=jnp.float32)    # unused

    out = mil_precision_score_mapping(x, score, precision, mil_prob)
    out = jax.block_until_ready(out)

    # pure-JAX reference (same semantics as nn.MaxPool2d(11, stride=11))
    ref = lax.reduce_window(x, -jnp.inf, lax.max,
                            window_dimensions=(1, 1, K, K),
                            window_strides=(1, 1, K, K),
                            padding="VALID")
    assert out.shape == (n, c, h // K, w // K), out.shape
    assert jnp.allclose(out, ref), "mismatch vs reference max-pool"

    # non-divisible spatial dims (floor-mode crop) + ragged channel grid
    # (nc=5 with cb=2 -> 3 grid steps, last one ragged)
    x2 = jax.random.normal(k2, (1, 5, 23, 37), dtype=jnp.float32)
    out2 = jax.block_until_ready(mil_precision_score_mapping(x2))
    ref2 = lax.reduce_window(x2, -jnp.inf, lax.max,
                             window_dimensions=(1, 1, K, K),
                             window_strides=(1, 1, K, K),
                             padding="VALID")
    assert out2.shape == (1, 5, 23 // K, 37 // K), out2.shape
    assert jnp.allclose(out2, ref2), "mismatch vs reference max-pool (crop/ragged case)"

    print("KERNEL_OK")
</pallas_src>

<mosaic_0001>
module attributes {stable_mosaic.version = 11 : i64} {
  func.func @_mil_maxpool_kernel(%arg0: i32, %arg1: memref<2x22x22xf32, #tpu.memory_space<vmem>>, %arg2: memref<2x2x2xf32, #tpu.memory_space<vmem>>) attributes {dimension_semantics = [#tpu.dimension_semantics<parallel>], iteration_bounds = array<i64: 4>, scalar_prefetch = 0 : i64, scratch_operands = 0 : i64, tpu.core_type = #tpu.core_type<tc>, window_params = [{transform_indices = @transform_0, window_bounds = array<i64: 2, 22, 22>}, {transform_indices = @transform_1, window_bounds = array<i64: 2, 2, 2>}]} {
    %0 = tpu.iota {dimensions = array<i32: 1>} : vector<1x2xi32>
    %c0 = arith.constant 0 : index
    %c0_0 = arith.constant 0 : index
    %c0_1 = arith.constant 0 : index
    %1 = vector.load %arg1[%c0, %c0_0, %c0_1] : memref<2x22x22xf32, #tpu.memory_space<vmem>>, vector<2x1x22xf32>
    %2 = vector.shape_cast %1 : vector<2x1x22xf32> to vector<2x22xf32>
    %c0_2 = arith.constant 0 : index
    %c1 = arith.constant 1 : index
    %c0_3 = arith.constant 0 : index
    %3 = vector.load %arg1[%c0_2, %c1, %c0_3] : memref<2x22x22xf32, #tpu.memory_space<vmem>>, vector<2x1x22xf32>
    %4 = vector.shape_cast %3 : vector<2x1x22xf32> to vector<2x22xf32>
    %c0_4 = arith.constant 0 : index
    %c2 = arith.constant 2 : index
    %c0_5 = arith.constant 0 : index
    %5 = vector.load %arg1[%c0_4, %c2, %c0_5] : memref<2x22x22xf32, #tpu.memory_space<vmem>>, vector<2x1x22xf32>
    %6 = vector.shape_cast %5 : vector<2x1x22xf32> to vector<2x22xf32>
    %c0_6 = arith.constant 0 : index
    %c3 = arith.constant 3 : index
    %c0_7 = arith.constant 0 : index
    %7 = vector.load %arg1[%c0_6, %c3, %c0_7] : memref<2x22x22xf32, #tpu.memory_space<vmem>>, vector<2x1x22xf32>
    %8 = vector.shape_cast %7 : vector<2x1x22xf32> to vector<2x22xf32>
    %c0_8 = arith.constant 0 : index
    %c4 = arith.constant 4 : index
    %c0_9 = arith.constant 0 : index
    %9 = vector.load %arg1[%c0_8, %c4, %c0_9] : memref<2x22x22xf32, #tpu.memory_space<vmem>>, vector<2x1x22xf32>
    %10 = vector.shape_cast %9 : vector<2x1x22xf32> to vector<2x22xf32>
    %c0_10 = arith.constant 0 : index
    %c5 = arith.constant 5 : index
    %c0_11 = arith.constant 0 : index
    %11 = vector.load %arg1[%c0_10, %c5, %c0_11] : memref<2x22x22xf32, #tpu.memory_space<vmem>>, vector<2x1x22xf32>
    %12 = vector.shape_cast %11 : vector<2x1x22xf32> to vector<2x22xf32>
    %c0_12 = arith.constant 0 : index
    %c6 = arith.constant 6 : index
    %c0_13 = arith.constant 0 : index
    %13 = vector.load %arg1[%c0_12, %c6, %c0_13] : memref<2x22x22xf32, #tpu.memory_space<vmem>>, vector<2x1x22xf32>
    %14 = vector.shape_cast %13 : vector<2x1x22xf32> to vector<2x22xf32>
    %c0_14 = arith.constant 0 : index
    %c7 = arith.constant 7 : index
    %c0_15 = arith.constant 0 : index
    %15 = vector.load %arg1[%c0_14, %c7, %c0_15] : memref<2x22x22xf32, #tpu.memory_space<vmem>>, vector<2x1x22xf32>
    %16 = vector.shape_cast %15 : vector<2x1x22xf32> to vector<2x22xf32>
    %c0_16 = arith.constant 0 : index
    %c8 = arith.constant 8 : index
    %c0_17 = arith.constant 0 : index
    %17 = vector.load %arg1[%c0_16, %c8, %c0_17] : memref<2x22x22xf32, #tpu.memory_space<vmem>>, vector<2x1x22xf32>
    %18 = vector.shape_cast %17 : vector<2x1x22xf32> to vector<2x22xf32>
    %c0_18 = arith.constant 0 : index
    %c9 = arith.constant 9 : index
    %c0_19 = arith.constant 0 : index
    %19 = vector.load %arg1[%c0_18, %c9, %c0_19] : memref<2x22x22xf32, #tpu.memory_space<vmem>>, vector<2x1x22xf32>
    %20 = vector.shape_cast %19 : vector<2x1x22xf32> to vector<2x22xf32>
    %c0_20 = arith.constant 0 : index
    %c10 = arith.constant 10 : index
    %c0_21 = arith.constant 0 : index
    %21 = vector.load %arg1[%c0_20, %c10, %c0_21] : memref<2x22x22xf32, #tpu.memory_space<vmem>>, vector<2x1x22xf32>
    %22 = vector.shape_cast %21 : vector<2x1x22xf32> to vector<2x22xf32>
    %23 = arith.maximumf %2, %4 : vector<2x22xf32>
    %24 = arith.maximumf %6, %8 : vector<2x22xf32>
    %25 = arith.maximumf %10, %12 : vector<2x22xf32>
    %26 = arith.maximumf %14, %16 : vector<2x22xf32>
    %27 = arith.maximumf %18, %20 : vector<2x22xf32>
    %28 = arith.maximumf %23, %24 : vector<2x22xf32>
    %29 = arith.maximumf %25, %26 : vector<2x22xf32>
    %30 = arith.maximumf %27, %22 : vector<2x22xf32>
    %31 = arith.maximumf %28, %29 : vector<2x22xf32>
    %32 = arith.maximumf %31, %30 : vector<2x22xf32>
    %cst = arith.constant 0.000000e+00 : f32
    %33 = vector.broadcast %cst : f32 to vector<2x2xf32>
    %34 = vector.extract_strided_slice %32 {offsets = [0, 0], sizes = [2, 11], strides = [1, 1]} : vector<2x22xf32> to vector<2x11xf32>
    %cst_22 = arith.constant dense<0xFF800000> : vector<2xf32>
    %35 = vector.multi_reduction <maximumf>, %34, %cst_22 [1] : vector<2x11xf32> to vector<2xf32>
    %36 = vector.shape_cast %35 : vector<2xf32> to vector<2x1xf32>
    %c0_i32 = arith.constant 0 : i32
    %37 = vector.broadcast %c0_i32 : i32 to vector<1x2xi32>
    %38 = arith.cmpi eq, %0, %37 : vector<1x2xi32>
    %39 = vector.shape_cast %38 : vector<1x2xi1> to vector<1x2xi1>
    %40 = vector.broadcast %39 : vector<1x2xi1> to vector<2x2xi1>
    %41 = vector.shape_cast %36 : vector<2x1xf32> to vector<2x1xf32>
    %42 = vector.broadcast %41 : vector<2x1xf32> to vector<2x2xf32>
    %43 = arith.select %40, %42, %33 : vector<2x2xi1>, vector<2x2xf32>
    %44 = vector.extract_strided_slice %32 {offsets = [0, 11], sizes = [2, 11], strides = [1, 1]} : vector<2x22xf32> to vector<2x11xf32>
    %cst_23 = arith.constant dense<0xFF800000> : vector<2xf32>
    %45 = vector.multi_reduction <maximumf>, %44, %cst_23 [1] : vector<2x11xf32> to vector<2xf32>
    %46 = vector.shape_cast %45 : vector<2xf32> to vector<2x1xf32>
    %c1_i32 = arith.constant 1 : i32
    %47 = vector.broadcast %c1_i32 : i32 to vector<1x2xi32>
    %48 = arith.cmpi eq, %0, %47 : vector<1x2xi32>
    %49 = vector.shape_cast %48 : vector<1x2xi1> to vector<1x2xi1>
    %50 = vector.broadcast %49 : vector<1x2xi1> to vector<2x2xi1>
    %51 = vector.shape_cast %46 : vector<2x1xf32> to vector<2x1xf32>
    %52 = vector.broadcast %51 : vector<2x1xf32> to vector<2x2xf32>
    %53 = arith.select %50, %52, %43 : vector<2x2xi1>, vector<2x2xf32>
    %c0_24 = arith.constant 0 : index
    %c0_25 = arith.constant 0 : index
    %c0_26 = arith.constant 0 : index
    %54 = vector.load %arg2[%c0_24, %c0_25, %c0_26] : memref<2x2x2xf32, #tpu.memory_space<vmem>>, vector<2x1x2xf32>
    %55 = vector.shape_cast %54 : vector<2x1x2xf32> to vector<2x2xf32>
    %56 = vector.shape_cast %53 : vector<2x2xf32> to vector<2x1x2xf32>
    tpu.vector_store %arg2[%c0_24, %c0_25, %c0_26], %56 {strides = array<i32>} : memref<2x2x2xf32, #tpu.memory_space<vmem>>, vector<2x1x2xf32>,
    %c0_27 = arith.constant 0 : index
    %c11 = arith.constant 11 : index
    %c0_28 = arith.constant 0 : index
    %57 = vector.load %arg1[%c0_27, %c11, %c0_28] : memref<2x22x22xf32, #tpu.memory_space<vmem>>, vector<2x1x22xf32>
    %58 = vector.shape_cast %57 : vector<2x1x22xf32> to vector<2x22xf32>
    %c0_29 = arith.constant 0 : index
    %c12 = arith.constant 12 : index
    %c0_30 = arith.constant 0 : index
    %59 = vector.load %arg1[%c0_29, %c12, %c0_30] : memref<2x22x22xf32, #tpu.memory_space<vmem>>, vector<2x1x22xf32>
    %60 = vector.shape_cast %59 : vector<2x1x22xf32> to vector<2x22xf32>
    %c0_31 = arith.constant 0 : index
    %c13 = arith.constant 13 : index
    %c0_32 = arith.constant 0 : index
    %61 = vector.load %arg1[%c0_31, %c13, %c0_32] : memref<2x22x22xf32, #tpu.memory_space<vmem>>, vector<2x1x22xf32>
    %62 = vector.shape_cast %61 : vector<2x1x22xf32> to vector<2x22xf32>
    %c0_33 = arith.constant 0 : index
    %c14 = arith.constant 14 : index
    %c0_34 = arith.constant 0 : index
    %63 = vector.load %arg1[%c0_33, %c14, %c0_34] : memref<2x22x22xf32, #tpu.memory_space<vmem>>, vector<2x1x22xf32>
    %64 = vector.shape_cast %63 : vector<2x1x22xf32> to vector<2x22xf32>
    %c0_35 = arith.constant 0 : index
    %c15 = arith.constant 15 : index
    %c0_36 = arith.constant 0 : index
    %65 = vector.load %arg1[%c0_35, %c15, %c0_36] : memref<2x22x22xf32, #tpu.memory_space<vmem>>, vector<2x1x22xf32>
    %66 = vector.shape_cast %65 : vector<2x1x22xf32> to vector<2x22xf32>
    %c0_37 = arith.constant 0 : index
    %c16 = arith.constant 16 : index
    %c0_38 = arith.constant 0 : index
    %67 = vector.load %arg1[%c0_37, %c16, %c0_38] : memref<2x22x22xf32, #tpu.memory_space<vmem>>, vector<2x1x22xf32>
    %68 = vector.shape_cast %67 : vector<2x1x22xf32> to vector<2x22xf32>
    %c0_39 = arith.constant 0 : index
    %c17 = arith.constant 17 : index
    %c0_40 = arith.constant 0 : index
    %69 = vector.load %arg1[%c0_39, %c17, %c0_40] : memref<2x22x22xf32, #tpu.memory_space<vmem>>, vector<2x1x22xf32>
    %70 = vector.shape_cast %69 : vector<2x1x22xf32> to vector<2x22xf32>
    %c0_41 = arith.constant 0 : index
    %c18 = arith.constant 18 : index
    %c0_42 = arith.constant 0 : index
    %71 = vector.load %arg1[%c0_41, %c18, %c0_42] : memref<2x22x22xf32, #tpu.memory_space<vmem>>, vector<2x1x22xf32>
    %72 = vector.shape_cast %71 : vector<2x1x22xf32> to vector<2x22xf32>
    %c0_43 = arith.constant 0 : index
    %c19 = arith.constant 19 : index
    %c0_44 = arith.constant 0 : index
    %73 = vector.load %arg1[%c0_43, %c19, %c0_44] : memref<2x22x22xf32, #tpu.memory_space<vmem>>, vector<2x1x22xf32>
    %74 = vector.shape_cast %73 : vector<2x1x22xf32> to vector<2x22xf32>
    %c0_45 = arith.constant 0 : index
    %c20 = arith.constant 20 : index
    %c0_46 = arith.constant 0 : index
    %75 = vector.load %arg1[%c0_45, %c20, %c0_46] : memref<2x22x22xf32, #tpu.memory_space<vmem>>, vector<2x1x22xf32>
    %76 = vector.shape_cast %75 : vector<2x1x22xf32> to vector<2x22xf32>
    %c0_47 = arith.constant 0 : index
    %c21 = arith.constant 21 : index
    %c0_48 = arith.constant 0 : index
    %77 = vector.load %arg1[%c0_47, %c21, %c0_48] : memref<2x22x22xf32, #tpu.memory_space<vmem>>, vector<2x1x22xf32>
    %78 = vector.shape_cast %77 : vector<2x1x22xf32> to vector<2x22xf32>
    %79 = arith.maximumf %58, %60 : vector<2x22xf32>
    %80 = arith.maximumf %62, %64 : vector<2x22xf32>
    %81 = arith.maximumf %66, %68 : vector<2x22xf32>
    %82 = arith.maximumf %70, %72 : vector<2x22xf32>
    %83 = arith.maximumf %74, %76 : vector<2x22xf32>
    %84 = arith.maximumf %79, %80 : vector<2x22xf32>
    %85 = arith.maximumf %81, %82 : vector<2x22xf32>
    %86 = arith.maximumf %83, %78 : vector<2x22xf32>
    %87 = arith.maximumf %84, %85 : vector<2x22xf32>
    %88 = arith.maximumf %87, %86 : vector<2x22xf32>
    %cst_49 = arith.constant 0.000000e+00 : f32
    %89 = vector.broadcast %cst_49 : f32 to vector<2x2xf32>
    %90 = vector.extract_strided_slice %88 {offsets = [0, 0], sizes = [2, 11], strides = [1, 1]} : vector<2x22xf32> to vector<2x11xf32>
    %cst_50 = arith.constant dense<0xFF800000> : vector<2xf32>
    %91 = vector.multi_reduction <maximumf>, %90, %cst_50 [1] : vector<2x11xf32> to vector<2xf32>
    %92 = vector.shape_cast %91 : vector<2xf32> to vector<2x1xf32>
    %c0_i32_51 = arith.constant 0 : i32
    %93 = vector.broadcast %c0_i32_51 : i32 to vector<1x2xi32>
    %94 = arith.cmpi eq, %0, %93 : vector<1x2xi32>
    %95 = vector.shape_cast %94 : vector<1x2xi1> to vector<1x2xi1>
    %96 = vector.broadcast %95 : vector<1x2xi1> to vector<2x2xi1>
    %97 = vector.shape_cast %92 : vector<2x1xf32> to vector<2x1xf32>
    %98 = vector.broadcast %97 : vector<2x1xf32> to vector<2x2xf32>
    %99 = arith.select %96, %98, %89 : vector<2x2xi1>, vector<2x2xf32>
    %100 = vector.extract_strided_slice %88 {offsets = [0, 11], sizes = [2, 11], strides = [1, 1]} : vector<2x22xf32> to vector<2x11xf32>
    %cst_52 = arith.constant dense<0xFF800000> : vector<2xf32>
    %101 = vector.multi_reduction <maximumf>, %100, %cst_52 [1] : vector<2x11xf32> to vector<2xf32>
    %102 = vector.shape_cast %101 : vector<2xf32> to vector<2x1xf32>
    %c1_i32_53 = arith.constant 1 : i32
    %103 = vector.broadcast %c1_i32_53 : i32 to vector<1x2xi32>
    %104 = arith.cmpi eq, %0, %103 : vector<1x2xi32>
    %105 = vector.shape_cast %104 : vector<1x2xi1> to vector<1x2xi1>
    %106 = vector.broadcast %105 : vector<1x2xi1> to vector<2x2xi1>
    %107 = vector.shape_cast %102 : vector<2x1xf32> to vector<2x1xf32>
    %108 = vector.broadcast %107 : vector<2x1xf32> to vector<2x2xf32>
    %109 = arith.select %106, %108, %99 : vector<2x2xi1>, vector<2x2xf32>
    %c0_54 = arith.constant 0 : index
    %c1_55 = arith.constant 1 : index
    %c0_56 = arith.constant 0 : index
    %110 = vector.load %arg2[%c0_54, %c1_55, %c0_56] : memref<2x2x2xf32, #tpu.memory_space<vmem>>, vector<2x1x2xf32>
    %111 = vector.shape_cast %110 : vector<2x1x2xf32> to vector<2x2xf32>
    %112 = vector.shape_cast %109 : vector<2x2xf32> to vector<2x1x2xf32>
    tpu.vector_store %arg2[%c0_54, %c1_55, %c0_56], %112 {strides = array<i32>} : memref<2x2x2xf32, #tpu.memory_space<vmem>>, vector<2x1x2xf32>,
    return
  }
  func.func @transform_0(%arg0: i32) -> (i32, i32, i32) {
    %c0_i32 = arith.constant 0 : i32
    %c0_i32_0 = arith.constant 0 : i32
    %c0_i32_1 = arith.constant 0 : i32
    return %arg0, %c0_i32, %c0_i32_0 : i32, i32, i32
  }
  func.func @transform_1(%arg0: i32) -> (i32, i32, i32) {
    %c0_i32 = arith.constant 0 : i32
    %c0_i32_0 = arith.constant 0 : i32
    %c0_i32_1 = arith.constant 0 : i32
    return %arg0, %c0_i32, %c0_i32_0 : i32, i32, i32
  }
}

</mosaic_0001>

<bundles_post_ra>
// kernel: tpu_custom_call.1
= control target key start
LH: loop header
LB: loop body
LE: loop exit
PB: predicated region body
PF: predicated region fallthrough
CT: control target
= control target key end

     0   :  { %s395_s6 = smov 0   ;;  %s472_s0 = inlined_call_operand.vmem [shape: f32[8,22,22], index: 0, kind: input, shape index: {}]   ;;  %s473_s1 = inlined_call_operand.vmem [shape: f32[8,2,2], index: 1, kind: output, shape index: {}]  }
   0x1 LB: > { %s355_s7 = sadd.s32 4294967295, %s382_s6   ;;  %p359_p0 = scmp.ge.s32.totalorder %s382_s6, 1  ;;  %s382_s6 = sphi %s395_s6, %s11_s6  }
   0x2   : > { %p89_p1 = scmp.lt.s32.totalorder %s382_s6, 5 }
   0x4   : > { %p90_p2 = pnand %p359_p0, %p89_p1 }
   0x5   : > { %s360_s8 = sshll.u32 (!%p90_p2), %s355_s7, 1  ;;  %vm170_vm0 = vcmask (!%p90_p2), 1041409   ;;  %vm173_vm1 = vcmask (!%p90_p2), 82944   ;;  %vm181_vm2 = vcmask (!%p90_p2), 173144   ;;  %vm214_vm5 = vcmask (!%p90_p2), 8192  }
   0x6   : > { %93 = sbr.rel (%p90_p2) target bundleno = 193 (0xc1), region = 24  ;;  %p111_p3 = scmp.lt.s32.totalorder (!%p90_p2), %s360_s8, 7 }
   0xd   : > { %s475_s8 = smov (!%p111_p3, %s360_s8), 7 }
   0xe   : > { %s366_s9 = smul.u32 24, %s475_s8  ;;  %s363_s13 = sshll.u32 %s475_s8, 1 }
   0xf   : > { %s121_s16 = scalar_lea.vmem %s473_s1, %s363_s13 }
  0x10   : > { %s409_s12 = scalar_lea.vmem %s472_s0, %s366_s9 }
  0x11   : > { %v125_v0 = vld [vmem:[%s409_s12] sm:$0x1]  ;;  %v126_v1 = vld [vmem:[%s409_s12 + $0x18] sm:$0x1]  ;;  %v127_v2 = vld [vmem:[%s409_s12 + $0x1] sm:$0x1] }
  0x12   : > { %v128_v3 = vld [vmem:[%s409_s12 + $0x19] sm:$0x1]  ;;  %v129_v4 = vld [vmem:[%s409_s12 + $0x2] sm:$0x1]  ;;  %v130_v5 = vld [vmem:[%s409_s12 + $0x1a] sm:$0x1]  ;;  %v147_v6 = vmax.f32 %v125_v0, %v127_v2 }
  0x13   : > { %v131_v7 = vld [vmem:[%s409_s12 + $0x3] sm:$0x1]  ;;  %v132_v8 = vld [vmem:[%s409_s12 + $0x1b] sm:$0x1]  ;;  %v133_v9 = vld [vmem:[%s409_s12 + $0x4] sm:$0x1]  ;;  %v148_v10 = vmax.f32 %v126_v1, %v128_v3 }
  0x14   : > { %v134_v11 = vld [vmem:[%s409_s12 + $0x1c] sm:$0x1]  ;;  %v135_v12 = vld [vmem:[%s409_s12 + $0x5] sm:$0x1]  ;;  %v136_v13 = vld [vmem:[%s409_s12 + $0x1d] sm:$0x1]  ;;  %v149_v14 = vmax.f32 %v129_v4, %v131_v7  ;;  %v150_v15 = vmax.f32 %v130_v5, %v132_v8 }
  0x15   : > { %v137_v16 = vld [vmem:[%s409_s12 + $0x6] sm:$0x1]  ;;  %v138_v17 = vld [vmem:[%s409_s12 + $0x1e] sm:$0x1]  ;;  %v139_v18 = vld [vmem:[%s409_s12 + $0x7] sm:$0x1]  ;;  %v151_v19 = vmax.f32 %v133_v9, %v135_v12  ;;  %v152_v20 = vmax.f32 %v134_v11, %v136_v13 }
  0x16   : > { %v140_v21 = vld [vmem:[%s409_s12 + $0x1f] sm:$0x1]  ;;  %v141_v22 = vld [vmem:[%s409_s12 + $0x8] sm:$0x1]  ;;  %v142_v23 = vld [vmem:[%s409_s12 + $0x20] sm:$0x1]  ;;  %v153_v24 = vmax.f32 %v137_v16, %v139_v18  ;;  %v157_v25 = vmax.f32 %v147_v6, %v149_v14  ;;  %v158_v30 = vmax.f32 %v148_v10, %v150_v15 }
  0x17   : > { %v143_v26 = vld [vmem:[%s409_s12 + $0x9] sm:$0x1]  ;;  %v144_v27 = vld [vmem:[%s409_s12 + $0x21] sm:$0x1]  ;;  %v145_v28 = vld [vmem:[%s409_s12 + $0xa] sm:$0x1]  ;;  %v154_v29 = vmax.f32 %v138_v17, %v140_v21 }
  0x18   : > { %v146_v31 = vld [vmem:[%s409_s12 + $0x22] sm:$0x1]  ;;  %v155_v32 = vmax.f32 %v141_v22, %v143_v26  ;;  %v156_v33 = vmax.f32 %v142_v23, %v144_v27  ;;  %v159_v34 = vmax.f32 %v151_v19, %v153_v24  ;;  %v217_v35 = vld [vmem:[%s409_s12 + $0xb] sm:$0x1]  ;;  %v218_v36 = vld [vmem:[%s409_s12 + $0x23] sm:$0x1] }
  0x19   : > { %v160_v37 = vmax.f32 %v152_v20, %v154_v29  ;;  %v219_v38 = vld [vmem:[%s409_s12 + $0xc] sm:$0x1]  ;;  %v220_v39 = vld [vmem:[%s409_s12 + $0x24] sm:$0x1]  ;;  %v221_v40 = vld [vmem:[%s409_s12 + $0xd] sm:$0x1] }
  0x1a   : > { %v161_v41 = vmax.f32 %v155_v32, %v145_v28  ;;  %v162_v42 = vmax.f32 %v156_v33, %v146_v31  ;;  %v163_v43 = vmax.f32 %v157_v25, %v159_v34  ;;  %v222_v44 = vld [vmem:[%s409_s12 + $0x25] sm:$0x1]  ;;  %v223_v45 = vld [vmem:[%s409_s12 + $0xe] sm:$0x1]  ;;  %v224_v46 = vld [vmem:[%s409_s12 + $0x26] sm:$0x1]  ;;  %v239_v47 = vmax.f32 %v217_v35, %v219_v38 }
  0x1b   : > { %v164_v48 = vmax.f32 %v158_v30, %v160_v37  ;;  %v225_v49 = vld [vmem:[%s409_s12 + $0xf] sm:$0x1]  ;;  %v226_v50 = vld [vmem:[%s409_s12 + $0x27] sm:$0x1]  ;;  %v227_v51 = vld [vmem:[%s409_s12 + $0x10] sm:$0x1]  ;;  %v240_v52 = vmax.f32 %v218_v36, %v220_v39  ;;  %v241_v53 = vmax.f32 %v221_v40, %v223_v45  ;;  %v242_v54 = vmax.f32 %v222_v44, %v224_v46 }
  0x1c   : > { %v228_v55 = vld [vmem:[%s409_s12 + $0x28] sm:$0x1]  ;;  %v229_v56 = vld [vmem:[%s409_s12 + $0x11] sm:$0x1]  ;;  %v230_v57 = vld [vmem:[%s409_s12 + $0x29] sm:$0x1]  ;;  %v243_v58 = vmax.f32 %v225_v49, %v227_v51  ;;  %v165_v59 = vmax.f32 %v163_v43, %v161_v41  ;;  %v123_v28 = vlaneseq }
  0x1d   : > { %v166_v60 = vmax.f32 %v164_v48, %v162_v42  ;;  %v231_v61 = vld [vmem:[%s409_s12 + $0x12] sm:$0x1]  ;;  %v232_v62 = vld [vmem:[%s409_s12 + $0x2a] sm:$0x1]  ;;  %v233_v63 = vld [vmem:[%s409_s12 + $0x13] sm:$0x1]  ;;  %v244_v0 = vmax.f32 %v226_v50, %v228_v55  ;;  %v249_v6 = vmax.f32 %v239_v47, %v241_v53  ;;  %v250_v7 = vmax.f32 %v240_v52, %v242_v54 }
  0x1e   : > { %v234_v1 = vld [vmem:[%s409_s12 + $0x2b] sm:$0x1]  ;;  %v235_v2 = vld [vmem:[%s409_s12 + $0x14] sm:$0x1]  ;;  %v236_v3 = vld [vmem:[%s409_s12 + $0x2c] sm:$0x1]  ;;  %v245_v4 = vmax.f32 %v229_v56, %v231_v61  ;;  %v246_v5 = vmax.f32 %v230_v57, %v232_v62 }
  0x1f   : > { %v169_v8 = vrot.slane %v166_v60, 7  ;;  %v237_v9 = vld [vmem:[%s409_s12 + $0x15] sm:$0x1]  ;;  %v238_v10 = vld [vmem:[%s409_s12 + $0x2d] sm:$0x1]  ;;  %v247_v11 = vmax.f32 %v233_v63, %v235_v2  ;;  %v248_v12 = vmax.f32 %v234_v1, %v236_v3  ;;  %v124_v31 = vand.u32 127, %v123_v28 }
  0x20   : > { %v251_v13 = vmax.f32 %v243_v58, %v245_v4  ;;  %v252_v14 = vmax.f32 %v244_v0, %v246_v5  ;;  %v384_v29 = vmov 1966171168   ;;  %v194_v33 = vshrl.u32 %v123_v28, 7 }
  0x21   : > { %v171_v15 = vsel %vm170_vm0, %v169_v8, %v165_v59  ;;  %v253_v16 = vmax.f32 %v247_v11, %v237_v9  ;;  %v254_v17 = vmax.f32 %v248_v12, %v238_v10  ;;  %v191_v30 = vunpack.c.l.s4 %v384_v29 }
  0x22   : > { %v174_v18 = vsel %vm173_vm1, %v171_v15, -inf  ;;  %v182_v19 = vsel %vm181_vm2, %v171_v15, -inf  ;;  %v255_v20 = vmax.f32 %v249_v6, %v251_v13  ;;  %v256_v21 = vmax.f32 %v250_v7, %v252_v14 }
  0x23   : > { %175 = vmax.xlane.f32.xlu0 %v174_v18  ;;  %183 = vmax.xlane.f32.xlu1 %v182_v19  ;;  %v192_v32 = vunpack.c.0.s8 %v191_v30  ;;  %vm177_vm3 = vcmp.eq.s32.totalorder %v124_v31, 0  ;;  %vm185_vm4 = vcmp.eq.s32.totalorder %v124_v31, 1 }
  0x24   : > { %v257_v22 = vmax.f32 %v255_v20, %v253_v16  ;;  %v258_v23 = vmax.f32 %v256_v21, %v254_v17 }
  0x25   : > { %v195_v34 = vsub.s32 %v192_v32, %v194_v33 }
  0x26   : > { %v261_v24 = vrot.slane %v258_v23, 7 }
  0x28   : > { %v262_v25 = vsel %vm170_vm0, %v261_v24, %v257_v22 }
  0x29   : > { %v264_v26 = vsel %vm173_vm1, %v262_v25, -inf  ;;  %v268_v27 = vsel %vm181_vm2, %v262_v25, -inf }
  0x2a   : > { %265 = vmax.xlane.f32.xlu0 %v264_v26  ;;  %269 = vmax.xlane.f32.xlu1 %v268_v27 }
  0xb0   : > { %v176_v35 = vpop.xlane.xlu0 %175  ;;  %v184_v36 = vpop.xlane.xlu1 %183 }
  0xb1   : > { %v180_v37 = vsel %vm177_vm3, %v176_v35, 0.0 }
  0xb2   : > { %v188_v38 = vsel %vm185_vm4, %v184_v36, %v180_v37 }
  0xb3   : > { %v196_v39 = vrot.slane %v188_v38, %v195_v34 }
  0xb5   : > { %v197_v40 = vcombine.high %v196_v39, %v196_v39  ;;  %v204_v41 = vrot.slane %v196_v39, %v195_v34 }
  0xb7   : > { %v211_v42 = vrot.slane %v197_v40, %v195_v34  ;;  %215 = vst.msk [vmem:[%s121_s16] sm:$0x1] %vm214_vm5, %v204_v41  ;;  %v266_v43 = vpop.xlane.xlu0 %265  ;;  %v270_v44 = vpop.xlane.xlu1 %269 }
  0xb8   : > { %v267_v45 = vsel %vm177_vm3, %v266_v43, 0.0 }
  0xb9   : > { %216 = vst.msk [vmem:[%s121_s16 + $0x2] sm:$0x1] %vm214_vm5, %v211_v42  ;;  %v271_v46 = vsel %vm185_vm4, %v270_v44, %v267_v45 }
  0xba   : > { %v279_v47 = vrot.slane %v271_v46, %v195_v34 }
  0xbc   : > { %v280_v48 = vcombine.high %v279_v47, %v279_v47  ;;  %v287_v49 = vrot.slane %v279_v47, %v195_v34 }
  0xbe   : > { %v294_v50 = vrot.slane %v280_v48, %v195_v34  ;;  %297 = vst.msk [vmem:[%s121_s16 + $0x1] sm:$0x1] %vm214_vm5, %v287_v49 }
  0xc0   : > { %298 = vst.msk [vmem:[%s121_s16 + $0x3] sm:$0x1] %vm214_vm5, %v294_v50 }
  0xc1 PF: > { %s11_s6 = sadd.s32 1, %s382_s6  }
  0xc2   : > { %p8_p4 = scmp.ge.s32.totalorder %s11_s6, 6  }
  0xc4   :  { %10 = sbr.rel (!%p8_p4) target bundleno = 1 (0x1), region = 54 }

</bundles_post_ra>
